<compile_context>
chip_gen: v5e
topology: v5e:2x2
jax: 0.10.0
libtpu: 0.0.40
codegen_flags: <defaults>
</compile_context>

<pallas_src>
import jax
import jax.numpy as jnp
from jax.experimental import pallas as pl
from jax.experimental.pallas import tpu as pltpu


def _mlp_kernel(x_ref, w1_ref, b1_ref, w2_ref, b2_ref, o_ref):
    # Hidden layer: x @ W1 + b1, ReLU.  bf16 operands, f32 MXU accumulation.
    h = jnp.dot(x_ref[...], w1_ref[...], preferred_element_type=jnp.float32)
    h = jnp.maximum(h + b1_ref[...], 0.0)          # b1 is (1, Hp) -> broadcast
    # Output layer: h @ W2 + b2 (cast h back to bf16 to keep the MXU bf16-fed).
    out = jnp.dot(h.astype(w2_ref.dtype), w2_ref[...],
                  preferred_element_type=jnp.float32)
    o_ref[...] = (out + b2_ref[...]).astype(o_ref.dtype)


def _round_up(n, m):
    return ((n + m - 1) // m) * m


def _pad2d(a, shape):
    pads = [(0, t - s) for s, t in zip(a.shape, shape)]
    if all(p == (0, 0) for p in pads):
        return a
    return jnp.pad(a, pads)


def mlp_forward(x, w1, b1, w2, b2, *, block_b=256):
    """Fused forward pass of Net: Linear(F->H) -> ReLU -> Linear(H->O).

    x  : (B, F)  float32
    w1 : (F, H)  float32   (PyTorch weight (H, F) transposed)
    b1 : (H,)    float32
    w2 : (H, O)  float32   (PyTorch weight (O, H) transposed)
    b2 : (O,)    float32
    returns (B, O) float32
    """
    B, F = x.shape
    H = w1.shape[1]
    O = w2.shape[1]

    # Lane-dense padded feature dims (multiples of 128).
    Hp = _round_up(H, 128)
    Op = _round_up(O, 128)

    # Batch tile: multiple of 8 sublanes, capped at block_b rows per grid step.
    tb = min(_round_up(block_b, 8), _round_up(B, 8))
    Bp = _round_up(B, tb)
    num_tiles = Bp // tb

    # Zero padding keeps semantics exact:
    #   padded hidden units: zero weight column + zero bias -> ReLU(0) = 0,
    #   and the matching W2 rows are zero, so they contribute nothing.
    #   padded outputs / batch rows are sliced off below.
    x_p = _pad2d(x, (Bp, F)).astype(jnp.bfloat16)
    w1_p = _pad2d(w1, (F, Hp)).astype(jnp.bfloat16)
    b1_p = _pad2d(b1.reshape(1, H), (1, Hp)).astype(jnp.float32)
    w2_p = _pad2d(w2, (Hp, Op)).astype(jnp.bfloat16)
    b2_p = _pad2d(b2.reshape(1, O), (1, Op)).astype(jnp.float32)

    out_shape = jax.ShapeDtypeStruct((Bp, Op), jnp.float32)

    flops = 2 * Bp * (F * Hp + Hp * Op)
    bytes_accessed = (x_p.size * 2 + w1_p.size * 2 + w2_p.size * 2
                      + b1_p.size * 4 + b2_p.size * 4 + Bp * Op * 4)
    cost = pl.CostEstimate(flops=flops, transcendentals=0,
                           bytes_accessed=bytes_accessed)

    if num_tiles == 1:
        # Tiny batch: no grid at all -> no per-step pipeline bookkeeping.
        # Whole (padded) arrays live in VMEM for the single invocation.
        out_p = pl.pallas_call(
            _mlp_kernel,
            out_shape=out_shape,
            cost_estimate=cost,
        )(x_p, w1_p, b1_p, w2_p, b2_p)
    else:
        # Batch-tiled grid: x/out are streamed tile-by-tile, weights/biases use
        # constant index_maps so they are DMA'd once and stay VMEM-resident.
        out_p = pl.pallas_call(
            _mlp_kernel,
            out_shape=out_shape,
            grid_spec=pltpu.PrefetchScalarGridSpec(
                num_scalar_prefetch=0,
                grid=(num_tiles,),
                in_specs=[
                    pl.BlockSpec((tb, F), lambda b: (b, 0)),     # x: streamed
                    pl.BlockSpec((F, Hp), lambda b: (0, 0)),     # W1: resident
                    pl.BlockSpec((1, Hp), lambda b: (0, 0)),     # b1: resident
                    pl.BlockSpec((Hp, Op), lambda b: (0, 0)),    # W2: resident
                    pl.BlockSpec((1, Op), lambda b: (0, 0)),     # b2: resident
                ],
                out_specs=pl.BlockSpec((tb, Op), lambda b: (b, 0)),
            ),
            compiler_params=pltpu.CompilerParams(
                # Batch tiles are independent -> shard across TCs on v7x.
                dimension_semantics=("parallel",),
            ),
            cost_estimate=cost,
        )(x_p, w1_p, b1_p, w2_p, b2_p)

    return out_p[:B, :O]


def _ref_forward(x, w1, b1, w2, b2):
    """Pure-JAX reference with the same bf16-operand / f32-accumulate recipe."""
    xb = x.astype(jnp.bfloat16)
    w1b = w1.astype(jnp.bfloat16)
    w2b = w2.astype(jnp.bfloat16)
    h = jnp.dot(xb, w1b, preferred_element_type=jnp.float32) + b1
    h = jnp.maximum(h, 0.0)
    return jnp.dot(h.astype(jnp.bfloat16), w2b,
                   preferred_element_type=jnp.float32) + b2


if __name__ == "__main__":
    # Shapes implied by Net(n_features, n_hidden_1, n_output)
    batch = 8
    n_features = 32
    n_hidden_1 = 64
    n_output = 16

    key = jax.random.PRNGKey(0)
    kx, kw1, kb1, kw2, kb2, kx2 = jax.random.split(key, 6)

    # PyTorch-style uniform init (bounds 1/sqrt(fan_in)), weights stored as
    # (in, out) — equivalent to PyTorch's (out, in).T.
    lim1 = 1.0 / jnp.sqrt(jnp.float32(n_features))
    w1 = jax.random.uniform(kw1, (n_features, n_hidden_1), jnp.float32, -lim1, lim1)
    b1 = jax.random.uniform(kb1, (n_hidden_1,), jnp.float32, -lim1, lim1)
    lim2 = 1.0 / jnp.sqrt(jnp.float32(n_hidden_1))
    w2 = jax.random.uniform(kw2, (n_hidden_1, n_output), jnp.float32, -lim2, lim2)
    b2 = jax.random.uniform(kb2, (n_output,), jnp.float32, -lim2, lim2)

    # --- small batch: grid-free single-block path ---
    x = jax.random.normal(kx, (batch, n_features), dtype=jnp.float32)
    out = jax.block_until_ready(mlp_forward(x, w1, b1, w2, b2))
    assert out.shape == (batch, n_output)
    ref = _ref_forward(x, w1, b1, w2, b2)
    assert jnp.allclose(out, ref, atol=1e-3, rtol=1e-3)
    # Loose sanity check against the pure-f32 module semantics.
    ref_f32 = jnp.maximum(x @ w1 + b1, 0.0) @ w2 + b2
    assert jnp.allclose(out, ref_f32, atol=5e-2, rtol=5e-2)

    # --- larger batch: batch-tiled, weight-resident, megacore-parallel path ---
    big_batch = 512
    x_big = jax.random.normal(kx2, (big_batch, n_features), dtype=jnp.float32)
    out_big = jax.block_until_ready(mlp_forward(x_big, w1, b1, w2, b2, block_b=256))
    assert out_big.shape == (big_batch, n_output)
    ref_big = _ref_forward(x_big, w1, b1, w2, b2)
    assert jnp.allclose(out_big, ref_big, atol=1e-3, rtol=1e-3)

    print("KERNEL_OK")
</pallas_src>

<mosaic_0001>
module attributes {stable_mosaic.version = 11 : i64} {
  func.func @_mlp_kernel(%arg0: memref<8x32xbf16, #tpu.memory_space<vmem>>, %arg1: memref<32x128xbf16, #tpu.memory_space<vmem>>, %arg2: memref<1x128xf32, #tpu.memory_space<vmem>>, %arg3: memref<128x128xbf16, #tpu.memory_space<vmem>>, %arg4: memref<1x128xf32, #tpu.memory_space<vmem>>, %arg5: memref<8x128xf32, #tpu.memory_space<vmem>>) attributes {dimension_semantics = [], scalar_prefetch = 0 : i64, scratch_operands = 0 : i64, tpu.core_type = #tpu.core_type<tc>} {
    %c0 = arith.constant 0 : index
    %c0_0 = arith.constant 0 : index
    %0 = vector.load %arg0[%c0, %c0_0] : memref<8x32xbf16, #tpu.memory_space<vmem>>, vector<8x32xbf16>
    %c0_1 = arith.constant 0 : index
    %c0_2 = arith.constant 0 : index
    %1 = vector.load %arg1[%c0_1, %c0_2] : memref<32x128xbf16, #tpu.memory_space<vmem>>, vector<32x128xbf16>
    %cst = arith.constant dense<0.000000e+00> : vector<8x128xf32>
    %2 = tpu.matmul %0, %1, %cst {dimension_numbers = #tpu.dot_dimension_numbers<[1], [0], [0], [1], [0, 0, 1, 1], [], []>} : vector<8x32xbf16>, vector<32x128xbf16>, vector<8x128xf32> -> vector<8x128xf32>
    %c0_3 = arith.constant 0 : index
    %c0_4 = arith.constant 0 : index
    %3 = vector.load %arg2[%c0_3, %c0_4] : memref<1x128xf32, #tpu.memory_space<vmem>>, vector<1x128xf32>
    %4 = vector.broadcast %3 : vector<1x128xf32> to vector<8x128xf32>
    %5 = arith.addf %2, %4 : vector<8x128xf32>
    %cst_5 = arith.constant 0.000000e+00 : f32
    %6 = vector.broadcast %cst_5 : f32 to vector<8x128xf32>
    %7 = arith.maximumf %5, %6 : vector<8x128xf32>
    %8 = arith.truncf %7 : vector<8x128xf32> to vector<8x128xbf16>
    %c0_6 = arith.constant 0 : index
    %c0_7 = arith.constant 0 : index
    %9 = vector.load %arg3[%c0_6, %c0_7] : memref<128x128xbf16, #tpu.memory_space<vmem>>, vector<128x128xbf16>
    %cst_8 = arith.constant dense<0.000000e+00> : vector<8x128xf32>
    %10 = tpu.matmul %8, %9, %cst_8 {dimension_numbers = #tpu.dot_dimension_numbers<[1], [0], [0], [1], [0, 0, 1, 1], [], []>} : vector<8x128xbf16>, vector<128x128xbf16>, vector<8x128xf32> -> vector<8x128xf32>
    %c0_9 = arith.constant 0 : index
    %c0_10 = arith.constant 0 : index
    %11 = vector.load %arg4[%c0_9, %c0_10] : memref<1x128xf32, #tpu.memory_space<vmem>>, vector<1x128xf32>
    %12 = vector.broadcast %11 : vector<1x128xf32> to vector<8x128xf32>
    %13 = arith.addf %10, %12 : vector<8x128xf32>
    %c0_11 = arith.constant 0 : index
    %c0_12 = arith.constant 0 : index
    %14 = vector.load %arg5[%c0_11, %c0_12] : memref<8x128xf32, #tpu.memory_space<vmem>>, vector<8x128xf32>
    tpu.vector_store %arg5[%c0_11, %c0_12], %13 {strides = array<i32>} : memref<8x128xf32, #tpu.memory_space<vmem>>, vector<8x128xf32>,
    return
  }
}

</mosaic_0001>

<bundles_post_ra>
// kernel: tpu_custom_call.1
= control target key start
LH: loop header
LB: loop body
LE: loop exit
PB: predicated region body
PF: predicated region fallthrough
CT: control target
= control target key end

     0   :  { %10 = vsyncpa [#allocation3], 0  ;;  %s422_s0 = inlined_call_operand.hbm [shape: bf16[8,32], index: 0, kind: input, shape index: {}]   ;;  %s423_s1 = inlined_call_operand.hbm [shape: bf16[32,128], index: 1, kind: input, shape index: {}]   ;;  %s424_s2 = inlined_call_operand.vmem [shape: f32[1,128], index: 2, kind: input, shape index: {}]   ;;  %s425_s3 = inlined_call_operand.hbm [shape: bf16[128,128], index: 3, kind: input, shape index: {}]   ;;  %s426_s4 = inlined_call_operand.vmem [shape: f32[1,128], index: 4, kind: input, shape index: {}]   ;;  %s427_s5 = inlined_call_operand.hbm [shape: f32[8,128], index: 5, kind: output, shape index: {}]  }
   0x1   :  { %11 = vsyncpa [#allocation6], 0  ;;  %s28_s20 = sshll.u32 %s423_s1, 4  ;;  %s29_s20 = int_to_ptr.hbm [resolvable:$true] %s28_s20 }
   0x2   :  { %12 = vsyncpa [#allocation4], 0  ;;  %s368_s21 = smov [#allocation5]   ;;  %s18_s25 = sshll.u32 %s422_s0, 4  ;;  %s19_s25 = int_to_ptr.hbm [resolvable:$true] %s18_s25 }
   0x3   :  { %s30_s22 = sshll.u32 %s368_s21, 4  ;;  %s369_s26 = smov 64   ;;  %s31_s22 = int_to_ptr.vmem [resolvable:$true] %s30_s22 }
   0x4   :  { %s370_s27 = smov 4   ;;  %s371_s28 = smov [#allocation2]  }
   0x5   :  { %36 = dma.hbm_to_vmem [thread:$0]  %s29_s20, 256, %s31_s22, [#allocation6], %s369_s26, %s369_s26, %s370_s27  }
   0x6   :  { %s20_s29 = sshll.u32 %s371_s28, 4  ;;  %s43_s7 = sshll.u32 %s425_s3, 4  ;;  %s21_s29 = int_to_ptr.vmem [resolvable:$true] %s20_s29  ;;  %s44_s7 = int_to_ptr.hbm [resolvable:$true] %s43_s7 }
   0x7   :  { %23 = dma.hbm_to_vmem [thread:$0]  %s19_s25, 64, %s21_s29, [#allocation3]  }
   0x8   :  { %s372_s1 = smov [#allocation7]  }
   0x9   :  { %s45_s8 = sshll.u32 %s372_s1, 4  ;;  %s46_s8 = int_to_ptr.vmem [resolvable:$true] %s45_s8 }
   0xa   :  { %51 = dma.hbm_to_vmem [thread:$0]  %s44_s7, 1024, %s46_s8, [#allocation6], %s369_s26, %s369_s26, %s370_s27  }
   0xb   :  { %362 = dma.done.wait [#allocation3], 64  }
   0xc   :  { %363 = vsyncadd [#allocation3], 4294967232 }
   0xd   :  { %364 = dma.done.wait [#allocation6], 1280  }
   0xe   :  { %365 = vsyncadd [#allocation6], 4294966016  ;;  %v249_v0 = vld [vmem:[#allocation5 + $0x8] sm:$0xff]  ;;  %v248_v2 = vld [vmem:[#allocation5] sm:$0xff]  ;;  %vm88_vm0 = vcmask 261120   ;;  %s373_s11 = smov [#allocation8]  }
   0xf   :  { %v257_v1 = vld [vmem:[#allocation7 + $0x38] sm:$0xff]  ;;  %98 = vmatpush.bf16.msra.mxu0 %v249_v0  ;;  %v256_v3 = vld [vmem:[#allocation7 + $0x30] sm:$0xff]  ;;  %v67_v4 = vld [vmem:[#allocation2] sm:$0xf]  ;;  %s194_s12 = sshll.u32 %s373_s11, 4  ;;  %s196_s15 = sshll.u32 %s427_s5, 4  ;;  %s195_s12 = int_to_ptr.vmem [resolvable:$true] %s194_s12  ;;  %s197_s15 = int_to_ptr.hbm [resolvable:$true] %s196_s15 }
  0x10   :  { %175 = vmatpush.bf16.msra.mxu1 %v257_v1  ;;  %v255_v5 = vld [vmem:[#allocation7 + $0x28] sm:$0xff]  ;;  %v254_v6 = vld [vmem:[#allocation7 + $0x20] sm:$0xff]  ;;  %v253_v7 = vld [vmem:[#allocation7 + $0x18] sm:$0xff] }
  0x11   :  { %v252_v8 = vld [vmem:[#allocation7 + $0x10] sm:$0xff]  ;;  %v251_v9 = vld [vmem:[#allocation7 + $0x8] sm:$0xff]  ;;  %v250_v10 = vld [vmem:[#allocation7] sm:$0xff] }
  0x12   :  { %v264_v11 = vld [vmem:[%s424_s2] ss:$0 sm:$0xff] }
  0x13   :  { %99 = vmatpush.bf16.msra.mxu0 %v248_v2  ;;  %v265_v17 = vld [vmem:[%s426_s4] ss:$0 sm:$0xff] }
  0x14   :  { %176 = vmatpush.bf16.msra.mxu1 %v256_v3 }
  0x16   :  { %215 = vmatmul.msk.bf16.vlgmr.msra.gmra.mxu0 %vm88_vm0, %v67_v4 }
  0x18   :  { %177 = vmatpush.bf16.msra.mxu1 %v255_v5 }
  0x1c   :  { %178 = vmatpush.bf16.msra.mxu1 %v254_v6 }
  0x20   :  { %179 = vmatpush.bf16.msra.mxu1 %v253_v7 }
  0x24   :  { %180 = vmatpush.bf16.msra.mxu1 %v252_v8 }
  0x28   :  { %181 = vmatpush.bf16.msra.mxu1 %v251_v9 }
  0x2c   :  { %182 = vmatpush.bf16.msra.mxu1 %v250_v10 }
  0x93   :  { %v101_v12 = vpop.f32.mrf.mxu0 }
  0x94   :  { %v102_v13 = vadd.f32 %v264_v11, %v101_v12 }
  0x96   :  { %v105_v14 = vmax.f32 %v102_v13, 0.0 }
  0x98   :  { %v106_v15 = vpack.c.bf16 %v105_v14, %v105_v14 }
  0x9a   :  { %183 = vmatmul.bf16.vlgmr.msra.gmra.mxu1 %v106_v15 }
  0x9b   :  { %v103_v16 = vpop.f32.mrf.mxu0 }
 0x117   :  { %v184_v18 = vpop.f32.mrf.mxu1 }
 0x118   :  { %v185_v19 = vadd.f32 %v265_v17, %v184_v18 }
 0x11a   :  { %188 = vst [vmem:[#allocation8] sm:$0xff] %v185_v19 }
 0x11b   :  { %199 = dma.vmem_to_hbm [thread:$0]  %s195_s12, 128, %s197_s15, [#allocation4]  }
 0x11f   :  { %v186_v20 = vpop.f32.mrf.mxu1 }
 0x120   :  { %366 = dma.done.wait [#allocation4], 128  }
 0x121   :  { %367 = vsyncadd [#allocation4], 4294967168 }
 0x122   :  { %204 = vsyncpa [#allocation3], 1 }
 0x123   :  { %205 = vsyncpa [#allocation6], 1 }
 0x124   :  { %206 = vsyncpa [#allocation4], 1 }

</bundles_post_ra>
